<compile_context>
chip_gen: v7x
topology: tpu7x:2x2x1
jax: 0.10.0
libtpu: 0.0.40
codegen_flags: <defaults>
</compile_context>

<pallas_src>
import functools

import jax
import jax.numpy as jnp
from jax.experimental import pallas as pl
from jax.experimental.pallas import tpu as pltpu


_LEAKY_SLOPE = 0.01  # PyTorch nn.LeakyReLU default


def _leaky_relu(v, slope=_LEAKY_SLOPE):
    return jnp.where(v >= 0, v, slope * v)


def mcnnfc_kernel(x_ref, wc_ref, bc_ref, w1_ref, w2_ref, y_ref, z_ref):
    # x_ref: (tm, C) tile of flattened (L*N) rows. Weights are tiny, whole
    # matrices with constant index_maps -> resident in VMEM, fetched once.
    x = x_ref[...].astype(jnp.float32)

    # --- Conv1d(k=1): pointwise channel mixing + bias ---
    h = jnp.dot(x, wc_ref[...], preferred_element_type=jnp.float32)
    h = h + bc_ref[...]                                    # (tm, C) + (1, C)

    # --- InstanceNorm over last dim (biased var, eps=1e-5, no affine) ---
    mean = jnp.mean(h, axis=-1, keepdims=True)
    ctr = h - mean
    var = jnp.mean(ctr * ctr, axis=-1, keepdims=True)
    h = ctr * jax.lax.rsqrt(var + 1e-5)

    # --- LeakyReLU ---
    h = _leaky_relu(h)

    # --- fc1 / fc2 (Linear, no bias) + LeakyReLU, stored straight to the two
    #     outputs (no wrapper-side column-split pass over an interleaved slab).
    y = jnp.dot(h, w1_ref[...], preferred_element_type=jnp.float32)
    z = jnp.dot(h, w2_ref[...], preferred_element_type=jnp.float32)
    y_ref[...] = _leaky_relu(y).astype(y_ref.dtype)
    z_ref[...] = _leaky_relu(z).astype(z_ref.dtype)


def _num_tensorcores():
    """Best-effort TensorCores-per-device (2 on v7x, 1 on v5e/v6e)."""
    try:
        dev = jax.devices()[0]
        for attr in ("num_cores", "core_count", "num_tensorcores"):
            v = getattr(dev, attr, None)
            if isinstance(v, int) and v >= 1:
                return v
    except Exception:
        pass
    try:
        info = pltpu.get_tpu_info()
        for attr in ("num_cores", "core_count", "tensorcore_count"):
            v = getattr(info, attr, None)
            if isinstance(v, int) and v >= 1:
                return v
    except Exception:
        pass
    # Unknown part: assume 2 TCs.  Being wrong on a 1-TC part costs at most one
    # extra ~0.35 us grid step for small M; being wrong on v7x would idle a TC.
    return 2


def _pick_tile(M, sub, tm_target, num_cores):
    """Static row-tile selection (all arguments are Python ints at trace time)."""
    tm_target = max(sub, (int(tm_target) // sub) * sub)
    if M <= tm_target:
        # Whole problem fits in one target tile: split only on multi-TC parts.
        if num_cores >= 2 and M > sub:
            t = -(-M // num_cores)
        else:
            t = M
        return ((t + sub - 1) // sub) * sub
    # Large M: prefer a tile at/just below the target that divides M exactly
    # (no jnp.pad copy) and gives a grid length that's a multiple of the TC
    # count (balanced megacore sharding).  Fall back progressively.
    lo = max(sub, tm_target - 64 * sub)
    candidates = range(tm_target, lo - 1, -sub)
    for t in candidates:
        if M % t == 0 and (M // t) % num_cores == 0:
            return t
    for t in candidates:
        if M % t == 0:
            return t
    for t in candidates:
        if (-(-M // t)) % num_cores == 0:
            return t
    return tm_target


@functools.partial(jax.jit, static_argnames=("tm",))
def mcnnfc_forward(x, w_conv, b_conv, w1, w2, tm=2048):
    """x: (L, N, C); w_conv: (C, C, 1); b_conv: (C,); w1/w2: (bottleneck, C)."""
    L, N, C = x.shape
    bneck = w1.shape[0]
    M = L * N
    out_dtype = x.dtype   # flip to jnp.bfloat16 here if downstream allows.

    itemsize = jnp.dtype(x.dtype).itemsize
    sub = 8 if itemsize == 4 else (16 if itemsize == 2 else 32)
    num_cores = _num_tensorcores()
    tm_eff = _pick_tile(M, sub, tm, num_cores)
    Mp = ((M + tm_eff - 1) // tm_eff) * tm_eff

    x2 = x.reshape(M, C)
    if Mp != M:
        # Padded rows see h == conv bias (a constant row); var == 0 but eps
        # keeps rsqrt finite, and the rows are sliced off below.
        x2 = jnp.pad(x2, ((0, Mp - M), (0, 0)))

    # One-time operand prep, hoisted out of the kernel (no per-step casts).
    wc_t = jnp.transpose(w_conv[:, :, 0]).astype(jnp.float32)   # (C_in, C_out)
    bc = b_conv.reshape(1, C).astype(jnp.float32)
    w1_t = jnp.transpose(w1).astype(jnp.float32)                # (C, bneck)
    w2_t = jnp.transpose(w2).astype(jnp.float32)

    out_item = jnp.dtype(out_dtype).itemsize
    cost = pl.CostEstimate(
        flops=2 * M * (C * C + 2 * C * bneck),
        transcendentals=M,                                       # rsqrt per row
        bytes_accessed=(M * C + C * C + C + 2 * C * bneck) * itemsize
                       + 2 * M * bneck * out_item,
    )

    y2, z2 = pl.pallas_call(
        mcnnfc_kernel,
        out_shape=(jax.ShapeDtypeStruct((Mp, bneck), out_dtype),
                   jax.ShapeDtypeStruct((Mp, bneck), out_dtype)),
        grid=(Mp // tm_eff,),
        in_specs=[
            pl.BlockSpec((tm_eff, C), lambda i: (i, 0)),      # x rows tile
            pl.BlockSpec((C, C), lambda i: (0, 0)),           # conv weight (resident)
            pl.BlockSpec((1, C), lambda i: (0, 0)),           # conv bias   (resident)
            pl.BlockSpec((C, bneck), lambda i: (0, 0)),       # fc1 weight  (resident)
            pl.BlockSpec((C, bneck), lambda i: (0, 0)),       # fc2 weight  (resident)
        ],
        out_specs=(pl.BlockSpec((tm_eff, bneck), lambda i: (i, 0)),
                   pl.BlockSpec((tm_eff, bneck), lambda i: (i, 0))),
        compiler_params=pltpu.CompilerParams(
            dimension_semantics=("parallel",)),
        cost_estimate=cost,
    )(x2, wc_t, bc, w1_t, w2_t)

    if Mp != M:
        y2 = y2[:M]
        z2 = z2[:M]
    return y2.reshape(L, N, bneck), z2.reshape(L, N, bneck)


def _reference(x, w_conv, b_conv, w1, w2):
    # Pure-JAX mirror of the PyTorch forward, for a correctness check.
    h = jnp.einsum("lnc,oc->lno", x, w_conv[:, :, 0]) + b_conv
    mean = jnp.mean(h, axis=-1, keepdims=True)
    var = jnp.mean((h - mean) ** 2, axis=-1, keepdims=True)
    h = (h - mean) / jnp.sqrt(var + 1e-5)
    h = _leaky_relu(h)
    y = _leaky_relu(h @ w1.T)
    z = _leaky_relu(h @ w2.T)
    return y, z


def _run_case(key, L, N, C, bneck):
    kx, kwc, kbc, kw1, kw2 = jax.random.split(key, 5)
    x = jax.random.normal(kx, (L, N, C), dtype=jnp.float32)
    w_conv = jax.random.normal(kwc, (C, C, 1), dtype=jnp.float32) * 0.1
    b_conv = jax.random.normal(kbc, (C,), dtype=jnp.float32) * 0.1
    w1 = jax.random.normal(kw1, (bneck, C), dtype=jnp.float32) * 0.1
    w2 = jax.random.normal(kw2, (bneck, C), dtype=jnp.float32) * 0.1

    y, z = mcnnfc_forward(x, w_conv, b_conv, w1, w2)
    jax.block_until_ready((y, z))

    y_ref, z_ref = _reference(x, w_conv, b_conv, w1, w2)
    assert y.shape == (L, N, bneck) and z.shape == (L, N, bneck)
    assert jnp.allclose(y, y_ref, atol=1e-4, rtol=1e-4)
    assert jnp.allclose(z, z_ref, atol=1e-4, rtol=1e-4)


if __name__ == "__main__":
    key = jax.random.PRNGKey(0)
    k0, k1, k2 = jax.random.split(key, 3)

    # Small shape (single/split tile).
    _run_case(k0, L=8, N=2, C=32, bneck=64)
    # Larger shape exercising the multi-tile grid with no row padding.
    _run_case(k1, L=64, N=20, C=32, bneck=64)
    # Odd row count exercising the padded-rows path.
    _run_case(k2, L=7, N=3, C=32, bneck=64)

    print("KERNEL_OK")
</pallas_src>

<mosaic_0001>
module attributes {stable_mosaic.version = 11 : i64} {
  func.func @mcnnfc_kernel(%arg0: i32, %arg1: memref<8x32xf32, #tpu.memory_space<vmem>>, %arg2: memref<32x32xf32, #tpu.memory_space<vmem>>, %arg3: memref<1x32xf32, #tpu.memory_space<vmem>>, %arg4: memref<32x64xf32, #tpu.memory_space<vmem>>, %arg5: memref<32x64xf32, #tpu.memory_space<vmem>>, %arg6: memref<8x64xf32, #tpu.memory_space<vmem>>, %arg7: memref<8x64xf32, #tpu.memory_space<vmem>>) attributes {dimension_semantics = [#tpu.dimension_semantics<parallel>], iteration_bounds = array<i64: 2>, scalar_prefetch = 0 : i64, scratch_operands = 0 : i64, tpu.core_type = #tpu.core_type<tc>, window_params = [{transform_indices = @transform_0, window_bounds = array<i64: 8, 32>}, {pipeline_mode = #tpu.pipeline_mode<synchronous>, transform_indices = @transform_1, window_bounds = array<i64: 32, 32>}, {pipeline_mode = #tpu.pipeline_mode<synchronous>, transform_indices = @transform_2, window_bounds = array<i64: 1, 32>}, {pipeline_mode = #tpu.pipeline_mode<synchronous>, transform_indices = @transform_3, window_bounds = array<i64: 32, 64>}, {pipeline_mode = #tpu.pipeline_mode<synchronous>, transform_indices = @transform_4, window_bounds = array<i64: 32, 64>}, {transform_indices = @transform_5, window_bounds = array<i64: 8, 64>}, {transform_indices = @transform_6, window_bounds = array<i64: 8, 64>}]} {
    %c0 = arith.constant 0 : index
    %c0_0 = arith.constant 0 : index
    %0 = vector.load %arg1[%c0, %c0_0] : memref<8x32xf32, #tpu.memory_space<vmem>>, vector<8x32xf32>
    %c0_1 = arith.constant 0 : index
    %c0_2 = arith.constant 0 : index
    %1 = vector.load %arg2[%c0_1, %c0_2] : memref<32x32xf32, #tpu.memory_space<vmem>>, vector<32x32xf32>
    %cst = arith.constant dense<0.000000e+00> : vector<8x32xf32>
    %2 = tpu.matmul %0, %1, %cst {dimension_numbers = #tpu.dot_dimension_numbers<[1], [0], [0], [1], [0, 0, 1, 1], [], []>} : vector<8x32xf32>, vector<32x32xf32>, vector<8x32xf32> -> vector<8x32xf32>
    %c0_3 = arith.constant 0 : index
    %c0_4 = arith.constant 0 : index
    %3 = vector.load %arg3[%c0_3, %c0_4] : memref<1x32xf32, #tpu.memory_space<vmem>>, vector<1x32xf32>
    %4 = vector.broadcast %3 : vector<1x32xf32> to vector<8x32xf32>
    %5 = arith.addf %2, %4 : vector<8x32xf32>
    %cst_5 = arith.constant dense<0.000000e+00> : vector<8xf32>
    %6 = vector.multi_reduction <add>, %5, %cst_5 [1] : vector<8x32xf32> to vector<8xf32>
    %7 = vector.shape_cast %6 : vector<8xf32> to vector<8x1xf32>
    %cst_6 = arith.constant 3.200000e+01 : f32
    %8 = vector.broadcast %cst_6 : f32 to vector<8x1xf32>
    %9 = arith.divf %7, %8 : vector<8x1xf32>
    %10 = vector.broadcast %9 : vector<8x1xf32> to vector<8x32xf32>
    %11 = arith.subf %5, %10 : vector<8x32xf32>
    %12 = arith.mulf %11, %11 : vector<8x32xf32>
    %cst_7 = arith.constant dense<0.000000e+00> : vector<8xf32>
    %13 = vector.multi_reduction <add>, %12, %cst_7 [1] : vector<8x32xf32> to vector<8xf32>
    %14 = vector.shape_cast %13 : vector<8xf32> to vector<8x1xf32>
    %cst_8 = arith.constant 3.200000e+01 : f32
    %15 = vector.broadcast %cst_8 : f32 to vector<8x1xf32>
    %16 = arith.divf %14, %15 : vector<8x1xf32>
    %cst_9 = arith.constant 9.99999974E-6 : f32
    %17 = vector.broadcast %cst_9 : f32 to vector<8x1xf32>
    %18 = arith.addf %16, %17 : vector<8x1xf32>
    %19 = math.rsqrt %18 : vector<8x1xf32>
    %20 = vector.broadcast %19 : vector<8x1xf32> to vector<8x32xf32>
    %21 = arith.mulf %11, %20 : vector<8x32xf32>
    %cst_10 = arith.constant 0.000000e+00 : f32
    %22 = vector.broadcast %cst_10 : f32 to vector<8x32xf32>
    %23 = arith.cmpf oge, %21, %22 : vector<8x32xf32>
    %cst_11 = arith.constant 0.00999999977 : f32
    %24 = vector.broadcast %cst_11 : f32 to vector<8x32xf32>
    %25 = arith.mulf %24, %21 : vector<8x32xf32>
    %26 = arith.select %23, %21, %25 : vector<8x32xi1>, vector<8x32xf32>
    %c0_12 = arith.constant 0 : index
    %c0_13 = arith.constant 0 : index
    %27 = vector.load %arg4[%c0_12, %c0_13] : memref<32x64xf32, #tpu.memory_space<vmem>>, vector<32x64xf32>
    %cst_14 = arith.constant dense<0.000000e+00> : vector<8x64xf32>
    %28 = tpu.matmul %26, %27, %cst_14 {dimension_numbers = #tpu.dot_dimension_numbers<[1], [0], [0], [1], [0, 0, 1, 1], [], []>} : vector<8x32xf32>, vector<32x64xf32>, vector<8x64xf32> -> vector<8x64xf32>
    %c0_15 = arith.constant 0 : index
    %c0_16 = arith.constant 0 : index
    %29 = vector.load %arg5[%c0_15, %c0_16] : memref<32x64xf32, #tpu.memory_space<vmem>>, vector<32x64xf32>
    %cst_17 = arith.constant dense<0.000000e+00> : vector<8x64xf32>
    %30 = tpu.matmul %26, %29, %cst_17 {dimension_numbers = #tpu.dot_dimension_numbers<[1], [0], [0], [1], [0, 0, 1, 1], [], []>} : vector<8x32xf32>, vector<32x64xf32>, vector<8x64xf32> -> vector<8x64xf32>
    %cst_18 = arith.constant 0.000000e+00 : f32
    %31 = vector.broadcast %cst_18 : f32 to vector<8x64xf32>
    %32 = arith.cmpf oge, %28, %31 : vector<8x64xf32>
    %cst_19 = arith.constant 0.00999999977 : f32
    %33 = vector.broadcast %cst_19 : f32 to vector<8x64xf32>
    %34 = arith.mulf %33, %28 : vector<8x64xf32>
    %35 = arith.select %32, %28, %34 : vector<8x64xi1>, vector<8x64xf32>
    %c0_20 = arith.constant 0 : index
    %c0_21 = arith.constant 0 : index
    %36 = vector.load %arg6[%c0_20, %c0_21] : memref<8x64xf32, #tpu.memory_space<vmem>>, vector<8x64xf32>
    tpu.vector_store %arg6[%c0_20, %c0_21], %35 {strides = array<i32>} : memref<8x64xf32, #tpu.memory_space<vmem>>, vector<8x64xf32>,
    %cst_22 = arith.constant 0.000000e+00 : f32
    %37 = vector.broadcast %cst_22 : f32 to vector<8x64xf32>
    %38 = arith.cmpf oge, %30, %37 : vector<8x64xf32>
    %cst_23 = arith.constant 0.00999999977 : f32
    %39 = vector.broadcast %cst_23 : f32 to vector<8x64xf32>
    %40 = arith.mulf %39, %30 : vector<8x64xf32>
    %41 = arith.select %38, %30, %40 : vector<8x64xi1>, vector<8x64xf32>
    %c0_24 = arith.constant 0 : index
    %c0_25 = arith.constant 0 : index
    %42 = vector.load %arg7[%c0_24, %c0_25] : memref<8x64xf32, #tpu.memory_space<vmem>>, vector<8x64xf32>
    tpu.vector_store %arg7[%c0_24, %c0_25], %41 {strides = array<i32>} : memref<8x64xf32, #tpu.memory_space<vmem>>, vector<8x64xf32>,
    return
  }
  func.func @transform_0(%arg0: i32) -> (i32, i32) {
    %c0_i32 = arith.constant 0 : i32
    %c0_i32_0 = arith.constant 0 : i32
    return %arg0, %c0_i32 : i32, i32
  }
  func.func @transform_1(%arg0: i32) -> (i32, i32) {
    %c0_i32 = arith.constant 0 : i32
    %c0_i32_0 = arith.constant 0 : i32
    %c0_i32_1 = arith.constant 0 : i32
    return %c0_i32, %c0_i32_0 : i32, i32
  }
  func.func @transform_2(%arg0: i32) -> (i32, i32) {
    %c0_i32 = arith.constant 0 : i32
    %c0_i32_0 = arith.constant 0 : i32
    %c0_i32_1 = arith.constant 0 : i32
    return %c0_i32, %c0_i32_0 : i32, i32
  }
  func.func @transform_3(%arg0: i32) -> (i32, i32) {
    %c0_i32 = arith.constant 0 : i32
    %c0_i32_0 = arith.constant 0 : i32
    %c0_i32_1 = arith.constant 0 : i32
    return %c0_i32, %c0_i32_0 : i32, i32
  }
  func.func @transform_4(%arg0: i32) -> (i32, i32) {
    %c0_i32 = arith.constant 0 : i32
    %c0_i32_0 = arith.constant 0 : i32
    %c0_i32_1 = arith.constant 0 : i32
    return %c0_i32, %c0_i32_0 : i32, i32
  }
  func.func @transform_5(%arg0: i32) -> (i32, i32) {
    %c0_i32 = arith.constant 0 : i32
    %c0_i32_0 = arith.constant 0 : i32
    return %arg0, %c0_i32 : i32, i32
  }
  func.func @transform_6(%arg0: i32) -> (i32, i32) {
    %c0_i32 = arith.constant 0 : i32
    %c0_i32_0 = arith.constant 0 : i32
    return %arg0, %c0_i32 : i32, i32
  }
}

</mosaic_0001>

<bundles_post_ra>
// kernel: mcnnfc_forward.1
= control target key start
LH: loop header
LB: loop body
LE: loop exit
PB: predicated region body
PF: predicated region fallthrough
CT: control target
= control target key end

     0   :  { %12 = vsyncpa [#allocation3], 0  ;;  %s1094_s0 = inlined_call_operand.vmem [shape: f32[16,32], index: 0, kind: input, shape index: {}]   ;;  %s1095_s1 = inlined_call_operand.vmem [shape: f32[32,32], index: 1, kind: input, shape index: {}]   ;;  %s1096_s2 = inlined_call_operand.vmem [shape: f32[1,32], index: 2, kind: input, shape index: {}]   ;;  %s1097_s3 = inlined_call_operand.vmem [shape: f32[32,64], index: 3, kind: input, shape index: {}]   ;;  %s1098_s4 = inlined_call_operand.vmem [shape: f32[32,64], index: 4, kind: input, shape index: {}]   ;;  %s1099_s5 = inlined_call_operand.hbm [shape: f32[16,64], index: 5, kind: output, shape index: {0}]   ;;  %s1100_s6 = inlined_call_operand.hbm [shape: f32[16,64], index: 6, kind: output, shape index: {1}]  }
   0x1   :  { %14 = vsyncpa [#allocation3 + $0x1], 0 }
   0x2   :  { %15 = vsyncpa [#allocation5], 0 }
   0x3   :  { %17 = vsyncpa [#allocation5 + $0x1], 0  ;;  %s912_s21 = smov 0   ;;  %s914_s22 = smov 0  }
   0x4   :  { %s916_s23 = smov 0   ;;  %s918_s24 = smov 0  }
   0x5 LB: > { %s933_s25 = sadd.s32 4294967295, %s870_s24   ;;  %s644_s26 = sadd.s32 4294967294, %s870_s24   ;;  %s870_s24 = sphi %s918_s24, %s1106_s24   ;;  %s866_s23 = sphi %s916_s23, %s1105_s23   ;;  %s862_s22 = sphi %s914_s22, %s1104_s22   ;;  %s858_s21 = sphi %s912_s21, %s1103_s21  }
   0x6   : > { %s937_s27 = sadd.s32 1, %s870_s24   ;;  %s140_s28 = sadd.s32 1, %s866_s23 }
   0x7   : > { %s137_s29 = ssub.s32 %s870_s24, %s937_s27  ;;  %p150_p0 = scmp.ne.s32.totalorder %s866_s23, %s862_s22 }
   0x8   : > { %p138_p1 = scmp.eq.s32.totalorder %s137_s29, 0  ;;  %p151_p2 = scmp.eq.s32.totalorder %s933_s25, 1 }
   0x9   : > { %p156_p3 = scmp.ne.s32.totalorder %s862_s22, %s858_s21  ;;  %p157_p4 = scmp.eq.s32.totalorder %s644_s26, 1 }
   0xa   : > { %s948_s30 = scalar_select %p138_p1, %s866_s23, %s140_s28  }
   0xb   : > { %p950_p5 = por %p151_p2, %p150_p0  ;;  %p954_p6 = por %p157_p4, %p156_p3 }
   0xc   : > { %p647_p7 = scmp.ge.s32.totalorder %s870_s24, 1  ;;  %p220_p8 = scmp.lt.s32.totalorder %s870_s24, 3 }
   0xe   : > { %p221_p9 = pnand %p647_p7, %p220_p8 }
   0xf   : > { %v259_v0 = vld [vmem:[%s1095_s1] sm:$0xff] (!%p221_p9)  ;;  %v260_v1 = vld [vmem:[%s1095_s1 + $0x8] sm:$0xff] (!%p221_p9)  ;;  %v261_v2 = vld [vmem:[%s1095_s1 + $0x10] sm:$0xff] (!%p221_p9)  ;;  %v872_v3 = vmov (!%p221_p9), 0.0|0.0   ;;  %vm873_vm0 = vmmov (!%p221_p9), 0   ;;  %v874_v6 = vmov (!%p221_p9), 0.0  }
  0x10   : > { %224 = sbr.rel (%p221_p9) target bundleno = 806 (0x326), region = 40  ;;  %709 = vmatprep.subr.bf16.mxu0 (!%p221_p9), %v872_v3  ;;  %v710_v4 = vpack.c.bf16 (!%p221_p9), %v260_v1, %v259_v0  ;;  %v262_v5 = vld [vmem:[%s1095_s1 + $0x18] sm:$0xff] (!%p221_p9)  ;;  %684 = vmatprep.mubr.msk.f32.mxu0 (!%p221_p9), %vm873_vm0, %v874_v6  ;;  %p254_p10 = scmp.lt.s32.totalorder (!%p221_p9), %s933_s25, 1  ;;  %vm270_vm1 = vcmask (!%p221_p9), 261120   ;;  %v651_v9 = vld [vmem:[%s1096_s2] ss:$0 sm:$0xff] (!%p221_p9) }
  0x11   : > { %715 = vmatprep.subr.bf16.mxu1 (!%p221_p9), %v872_v3  ;;  %695 = vmatprep.mubr.msk.f32.mxu1 (!%p221_p9), %vm873_vm0, %v874_v6  ;;  %v713_v7 = vpack.c.bf16 (!%p221_p9), %v262_v5, %v261_v2  ;;  %v361_v19 = vld [vmem:[%s1097_s3] sm:$0xff] (!%p221_p9)  ;;  %v362_v20 = vld [vmem:[%s1097_s3 + $0x8] sm:$0xff] (!%p221_p9)  ;;  %v363_v24 = vld [vmem:[%s1097_s3 + $0x10] sm:$0xff] (!%p221_p9)  ;;  %s1013_s10 = sand.u32 (!%p221_p9), 1, %s862_s22   ;;  %s657_s12 = sshll.u32 (!%p221_p9), %s933_s25, 7  ;;  %vm515_vm3 = vcmask (!%p221_p9), 523264  }
  0x12   : > { %711 = vmatpush3.bf16.msra.mxu0 (!%p221_p9), %v710_v4  ;;  %v438_v21 = vld [vmem:[%s1098_s4] sm:$0xff] (!%p221_p9)  ;;  %v716_v22 = vpack.c.bf16 (!%p221_p9), %v362_v20, %v361_v19  ;;  %v439_v23 = vld [vmem:[%s1098_s4 + $0x8] sm:$0xff] (!%p221_p9)  ;;  %v364_v25 = vld [vmem:[%s1097_s3 + $0x18] sm:$0xff] (!%p221_p9)  ;;  %s648_s11 = sshll.u32 (!%p221_p9), %s1013_s10, 3  ;;  %s1020_s19 = scalar_lea.hbm (!%p221_p9), %s1099_s5, %s657_s12 }
  0x13   : > { %712 = vmatprep.subr.bf16.mxu0 (!%p221_p9), %v872_v3  ;;  %v722_v26 = vpack.c.bf16 (!%p221_p9), %v439_v23, %v438_v21  ;;  %v440_v27 = vld [vmem:[%s1098_s4 + $0x10] sm:$0xff] (!%p221_p9)  ;;  %v441_v28 = vld [vmem:[%s1098_s4 + $0x18] sm:$0xff] (!%p221_p9)  ;;  %v719_v29 = vpack.c.bf16 (!%p221_p9), %v364_v25, %v363_v24  ;;  %s246_s13 = scalar_lea.vmem (!%p221_p9), [#allocation2], %s648_s11  ;;  %s253_s15 = scalar_lea.vmem (!%p221_p9), [#allocation4], %s648_s11 }
  0x14   : > { %717 = vmatpush3.bf16.msra.mxu1 (!%p221_p9), %v716_v22  ;;  %v725_v30 = vpack.c.bf16 (!%p221_p9), %v441_v28, %v440_v27  ;;  %s540_s14 = sshll.u32 (!%p221_p9), %s246_s13, 4  ;;  %s553_s16 = sshll.u32 (!%p221_p9), %s253_s15, 4  ;;  %s1022_s14 = int_to_ptr.vmem [resolvable:$true] %s540_s14  ;;  %s1029_s16 = int_to_ptr.vmem [resolvable:$true] %s553_s16 }
  0x15   : > { %718 = vmatprep.subr.bf16.mxu1 (!%p221_p9), %v872_v3  ;;  %s522_s28 = scalar_lea.sflag (!%p221_p9), [#allocation3], %s1013_s10  ;;  %s776_s29 = scalar_lea.vmem (!%p221_p9), %s1022_s14, 128 }
  0x16   : > { %714 = vmatpush3.bf16.msra.mxu0 (!%p221_p9), %v713_v7  ;;  %p777_p11 = scmp.ne.s32.totalorder (!%p221_p9), %s1022_s14, %s776_s29  ;;  %s875_s9 = smov (!%p221_p9), [#allocation2]  }
  0x17   : > { %s255_s17 = scalar_select %p254_p10, %s933_s25, 1  ;;  %721 = vmatprep.subr.bf16.mxu0 %v872_v3 }
  0x18   : > { %720 = vmatpush3.bf16.msra.mxu1 %v719_v29  ;;  %p778_p12 = pnand %p777_p11, %p950_p5  ;;  %s780_s11 = sshll.u32 %s875_s9, 4  ;;  %s781_s11 = int_to_ptr.vmem [resolvable:$false] %s780_s11 }
  0x19   : > { %s650_s18 = sshll.u32 %s255_s17, 3  ;;  %s782_s17 = scalar_lea.vmem %s781_s11, 256 }
  0x1a   : > { %s257_s26 = scalar_lea.vmem %s1094_s0, %s650_s18  ;;  %p779_p13 = pneg %p778_p12 }
  0x1b   : > { %v258_v8 = vld [vmem:[%s257_s26] sm:$0xff]  ;;  %s1027_s26 = scalar_lea.hbm %s1100_s6, %s657_s12  ;;  %p783_p0 = scmp.lt.s32.totalorder %s1022_s14, %s781_s11 }
  0x1c   : > { %685 = vmatmul.mubr.msk.f32.vlgmr.msra.gmra.mrb[0].mxu0 %vm270_vm1, %v258_v8  ;;  %p784_p1 = scmp.lt.s32.totalorder %s782_s17, %s776_s29 }
  0x1d   : > { %706 = vmatprep.mubr.msk.f32.mxu0 %vm873_vm0, %v874_v6  ;;  %723 = vmatpush3.bf16.msra.mxu0 %v722_v26 }
  0x1e   : > { %724 = vmatprep.subr.bf16.mxu0 %v872_v3  ;;  %p785_p2 = por %p784_p1, %p783_p0 }
  0x20   : > { %p786_p3 = pnand %p785_p2, %p779_p13 }
  0x21   : > { %726 = vmatpush3.bf16.msra.mxu0 %v725_v30 }
  0xef   : > { %v340_v10 = vpop.f32.mrb[0].mxu0 }
  0xf0   : > { %v341_v11 = vadd.f32 %v651_v9, %v340_v10  ;;  %v686_v12 = vpop.f32.mrb[1].mxu0 }
  0xf2   : > { %v344_v13 = vsel %vm270_vm1, %v341_v11, 0.0 }
  0xf3   : > { %345 = vadd.xlane.f32.xlu0 %v344_v13 }
 0x180   : > { %v346_v14 = vpop.xlane.xlu0 %345 }
 0x181   : > { %v348_v15 = vmul.f32 0.03125, %v346_v14 }
 0x183   : > { %v349_v16 = vsub.f32 %v341_v11, %v348_v15 }
 0x185   : > { %v350_v17 = vmul.f32 %v349_v16, %v349_v16 }
 0x187   : > { %v351_v18 = vsel %vm270_vm1, %v350_v17, 0.0 }
 0x188   : > { %352 = vadd.xlane.f32.xlu0 %v351_v18 }
 0x215   : > { %v353_v31 = vpop.xlane.xlu0 %352 }
 0x216   : > { %v354_v32 = vmul.f32 0.03125, %v353_v31 }
 0x218   : > { %v355_v33 = vadd.f32 1e-05, %v354_v32 }
 0x21a   : > { %774 = vrsqrt.f32 %v355_v33 }
 0x224   : > { %v775_v34 = vpop.eup %774 }
 0x225   : > { %v357_v35 = vmul.f32 %v775_v34, %v349_v16 }
 0x227   : > { %vm358_vm2 = vcmp.ge.f32.partialorder %v357_v35, 0.0  ;;  %v359_v36 = vmul.f32 0.01, %v357_v35 }
 0x229   : > { %v360_v37 = vsel %vm358_vm2, %v357_v35, %v359_v36 }
 0x22a   : > { %696 = vmatmul.mubr.msk.f32.vlgmr.msra.gmra.mrb[0].mxu1 %vm270_vm1, %v360_v37  ;;  %707 = vmatmul.mubr.msk.f32.vlgmr.msra.gmra.mrb[2].mxu0 %vm270_vm1, %v360_v37 }
 0x2fd   : > { %v434_v38 = vpop.f32.mrb[0].mxu1  ;;  %v508_v39 = vpop.f32.mrb[2].mxu0 }
 0x2fe   : > { %vm512_vm4 = vcmp.ge.f32.partialorder %v434_v38, 0.0  ;;  %v513_v40 = vmul.f32 0.01, %v434_v38  ;;  %vm517_vm5 = vcmp.ge.f32.partialorder %v508_v39, 0.0  ;;  %v518_v41 = vmul.f32 0.01, %v508_v39 }
 0x2ff   : > { %v697_v42 = vpop.f32.mrb[1].mxu1  ;;  %v708_v43 = vpop.f32.mrb[3].mxu0 }
 0x300   : > { %v514_v44 = vsel %vm512_vm4, %v434_v38, %v513_v40  ;;  %v519_v45 = vsel %vm517_vm5, %v508_v39, %v518_v41 }
 0x301   : > { %516 = vst.msk [vmem:[%s246_s13] sm:$0xff] %vm515_vm3, %v514_v44  ;;  %520 = vst.msk [vmem:[%s253_s15] sm:$0xff] %vm515_vm3, %v519_v45 }
 0x302   : > { %789 = shalt.err (!%p786_p3)
}
 0x303   : > { %s790_s12 = scalar_lea.hbm %s1020_s19, 128  ;;  %s794_s18 = scalar_lea.hbm %s1099_s5, 256 }
 0x304   : > { %p791_p4 = scmp.ne.s32.totalorder %s1020_s19, %s790_s12  ;;  %p795_p9 = scmp.lt.u32.totalorder %s1020_s19, %s1099_s5 }
 0x305   : > { %p796_p10 = scmp.lt.u32.totalorder %s794_s18, %s790_s12  ;;  %p798_p12 = scmp.lt.u32.totalorder %s790_s12, %s1020_s19 }
 0x306   : > { %p792_p7 = pnand %p791_p4, %p950_p5 }
 0x307   : > { %p797_p11 = por %p796_p10, %p795_p9 }
 0x308   : > { %p793_p8 = pneg %p792_p7 }
 0x309   : > { %p799_p13 = por %p798_p12, %p797_p11 }
 0x30b   : > { %p800_p0 = pnand %p799_p13, %p793_p8 }
 0x30d   : > { %803 = shalt.err (!%p800_p0)
}
 0x30e   : > { %727 = dma.vmem_to_hbm [thread:$0]  (%p950_p5), %s1022_s14, 128, %s1020_s19, %s522_s28  }
 0x30f   : > { %s527_s29 = scalar_lea.sflag [#allocation5], %s1013_s10  ;;  %s804_s9 = scalar_lea.vmem %s1029_s16, 128 }
 0x310   : > { %p805_p1 = scmp.ne.s32.totalorder %s1029_s16, %s804_s9  ;;  %s876_s11 = smov [#allocation4]  }
 0x311   : > { %s808_s17 = sshll.u32 %s876_s11, 4  ;;  %s809_s17 = int_to_ptr.vmem [resolvable:$false] %s808_s17 }
 0x312   : > { %p806_p2 = pnand %p805_p1, %p950_p5  ;;  %s810_s12 = scalar_lea.vmem %s809_s17, 256 }
 0x313   : > { %p811_p4 = scmp.lt.s32.totalorder %s1029_s16, %s809_s17  ;;  %p812_p7 = scmp.lt.s32.totalorder %s810_s12, %s804_s9 }
 0x314   : > { %p807_p3 = pneg %p806_p2 }
 0x315   : > { %p813_p8 = por %p812_p7, %p811_p4 }
 0x317   : > { %p814_p9 = pnand %p813_p8, %p807_p3 }
 0x319   : > { %817 = shalt.err (!%p814_p9)
}
 0x31a   : > { %s818_s10 = scalar_lea.hbm %s1027_s26, 128  ;;  %s822_s28 = scalar_lea.hbm %s1100_s6, 256 }
 0x31b   : > { %p819_p10 = scmp.ne.s32.totalorder %s1027_s26, %s818_s10  ;;  %p823_p13 = scmp.lt.u32.totalorder %s1027_s26, %s1100_s6 }
 0x31c   : > { %p824_p0 = scmp.lt.u32.totalorder %s822_s28, %s818_s10  ;;  %p826_p2 = scmp.lt.u32.totalorder %s818_s10, %s1027_s26 }
 0x31d   : > { %p820_p11 = pnand %p819_p10, %p950_p5 }
 0x31e   : > { %p825_p1 = por %p824_p0, %p823_p13 }
 0x31f   : > { %p821_p12 = pneg %p820_p11 }
 0x320   : > { %p827_p3 = por %p826_p2, %p825_p1 }
 0x322   : > { %p828_p4 = pnand %p827_p3, %p821_p12 }
 0x324   : > { %831 = shalt.err (!%p828_p4)
}
 0x325   : > { %728 = dma.vmem_to_hbm [thread:$0]  (%p950_p5), %s1029_s16, 128, %s1027_s26, %s527_s29  }
 0x326 PF: > { %p738_p7 = scmp.ge.s32.totalorder %s870_s24, 2  ;;  %s565_s18 = sand.u32 1, %s858_s21  }
 0x327   : > { %s566_s25 = scalar_lea.sflag [#allocation3], %s565_s18 }
 0x328   : > { %p732_p8 = pnand %p738_p7, %p954_p6 }
 0x32a   : > { %849 = dma.done.wait (!%p732_p8), %s566_s25, 128  }
 0x32b   : > { %851 = vsyncadd (!%p732_p8), %s566_s25, 4294967168  ;;  %s575_s20 = scalar_lea.sflag [#allocation5], %s565_s18 }
 0x32c   : > { %853 = dma.done.wait (!%p732_p8), %s575_s20, 128  }
 0x32d   : > { %855 = vsyncadd (!%p732_p8), %s575_s20, 4294967168  ;;  %p20_p5 = scmp.ge.s32.totalorder %s937_s27, 4   ;;  %s1103_s21 = smov %s862_s22 }
 0x32e   : > { %s1104_s22 = smov %s866_s23  ;;  %s1105_s23 = smov %s948_s30 }
 0x32f   : > { %s1106_s24 = smov %s937_s27  ;;  %22 = sbr.rel (!%p20_p5) target bundleno = 5 (0x5), region = 92 }
 0x336   :  { %580 = vsyncpa [#allocation3], 1 }
 0x337   :  { %582 = vsyncpa [#allocation3 + $0x1], 1 }
 0x338   :  { %583 = vsyncpa [#allocation5], 1 }
 0x339   :  { %585 = vsyncpa [#allocation5 + $0x1], 1 }

</bundles_post_ra>
